<compile_context>
chip_gen: v7x
topology: tpu7x:2x2x1
jax: 0.10.0
libtpu: 0.0.40
codegen_flags: <defaults>
</compile_context>

<pallas_src>
import jax
import jax.numpy as jnp
from jax.experimental import pallas as pl
from jax.experimental.pallas import tpu as pltpu

# ----------------------------- model hyper-params ---------------------------
EMBEDDING_SIZE = 27          # embedding == 'number'
NUM_HIDDENS = 32
NUM_OUTPUTS = 5              # action head size (len(MOVE_LOOKUP)-style)
LEAKY_SLOPE = 0.01           # nn.LeakyReLU() default slope
OBS_DIM = 40                 # example raw observation length (>= 27)

LANE = 128
IN_PAD = LANE                # 27  -> 128 (extra obs entries hit zero W1 rows)
HID_PAD = LANE               # 32  -> 128
OUT_PAD = LANE               # 5   -> 128 (lane-dense, unmasked output row)
BIAS_LANE = LANE - 1         # lane 127 carries the constant-1 "bias input"


# ------------------------------- Pallas kernel -------------------------------
def fused_mlp_kernel(x_ref, p_ref, out_ref):
    """Whole SamplerFCNSimple.forward: (x@W1') -> LeakyReLU -> (h@W2'), biases folded."""
    x = x_ref[...]                                           # (1, IN_PAD), lane 127 == 1.0
    w1 = p_ref[pl.ds(0, IN_PAD), :]                          # (IN_PAD, HID_PAD), row 127 = [b1 | 1]
    w2 = p_ref[pl.ds(IN_PAD, HID_PAD), :]                    # (HID_PAD, OUT_PAD), row 127 = b2
    h = jnp.dot(x, w1, preferred_element_type=jnp.float32)   # bias1 included via lane 127
    h = jnp.where(h >= 0.0, h, LEAKY_SLOPE * h)              # LeakyReLU (h[127] stays 1.0)
    o = jnp.dot(h, w2, preferred_element_type=jnp.float32)   # bias2 included via h[127]
    out_ref[...] = o.astype(out_ref.dtype)                   # (1, OUT_PAD)


def _vmem_spec():
    return pl.BlockSpec(memory_space=pltpu.MemorySpace.VMEM)


@jax.jit
def sampler_fcn_simple_forward(packed_params, obs_padded):
    """One pallas_call for the whole forward pass. Returns (NUM_OUTPUTS,) logits."""
    out = pl.pallas_call(
        fused_mlp_kernel,
        out_shape=jax.ShapeDtypeStruct((1, OUT_PAD), jnp.float32),
        in_specs=[_vmem_spec(), _vmem_spec()],
        out_specs=_vmem_spec(),
    )(obs_padded, packed_params)
    return out[0, :NUM_OUTPUTS]


# ------------------------------ parameter setup ------------------------------
def init_params(key):
    """Unpadded, torch-Linear-like parameters (float32)."""
    ks = jax.random.split(key, 4)
    s1 = 1.0 / jnp.sqrt(jnp.float32(EMBEDDING_SIZE))
    s2 = 1.0 / jnp.sqrt(jnp.float32(NUM_HIDDENS))
    return {
        "w1": s1 * jax.random.normal(ks[0], (EMBEDDING_SIZE, NUM_HIDDENS), jnp.float32),
        "b1": s1 * jax.random.normal(ks[1], (NUM_HIDDENS,), jnp.float32),
        "w2": s2 * jax.random.normal(ks[2], (NUM_HIDDENS, NUM_OUTPUTS), jnp.float32),
        "b2": s2 * jax.random.normal(ks[3], (NUM_OUTPUTS,), jnp.float32),
    }


def pack_params(params):
    """Pack W1/W2 (with folded biases) into a single lane-dense (256, 128) f32 slab.

    Rows   0:128 -> W1 block:  [:27,:32] = w1, row 127 = [b1 | ... | 1.0 at lane 127]
    Rows 128:256 -> W2 block:  [:32,:5]  = w2, row 127 = b2
    All other entries are exactly 0, so padded lanes contribute nothing.
    """
    p = jnp.zeros((IN_PAD + HID_PAD, LANE), jnp.float32)
    # --- W1 block ---
    p = p.at[:EMBEDDING_SIZE, :NUM_HIDDENS].set(params["w1"])
    p = p.at[BIAS_LANE, :NUM_HIDDENS].set(params["b1"])        # b1 (multiplied by obs lane 127 == 1)
    p = p.at[BIAS_LANE, BIAS_LANE].set(1.0)                    # pass the constant 1 through to h[127]
    # --- W2 block ---
    p = p.at[IN_PAD:IN_PAD + NUM_HIDDENS, :NUM_OUTPUTS].set(params["w2"])
    p = p.at[IN_PAD + BIAS_LANE, :NUM_OUTPUTS].set(params["b2"])   # b2 (multiplied by h[127] == 1)
    return p


def pad_obs(obs):
    """Place obs[0][:27] in a lane-dense (1, 128) buffer with lane 127 == 1.0 (bias input).

    Entries >= EMBEDDING_SIZE of the raw obs are discarded, exactly like the
    reference module's obs[0][:27] slice.
    """
    row = jnp.zeros((1, IN_PAD), jnp.float32)
    row = row.at[0, :EMBEDDING_SIZE].set(obs[0, :EMBEDDING_SIZE].astype(jnp.float32))
    row = row.at[0, BIAS_LANE].set(1.0)
    return row


def make_obs(key):
    cur_node = 5
    obs = jnp.zeros((1, OBS_DIM), jnp.float32)
    obs = obs.at[0, cur_node - 1].set(1.0)                         # one-hot location
    obs = obs.at[0, :EMBEDDING_SIZE].add(
        0.05 * jax.random.uniform(key, (EMBEDDING_SIZE,), jnp.float32))
    obs = obs.at[0, EMBEDDING_SIZE:].set(
        jax.random.uniform(jax.random.fold_in(key, 1),
                           (OBS_DIM - EMBEDDING_SIZE,), jnp.float32))  # ignored by forward
    return obs


# ------------------------------ pure-JAX reference ---------------------------
def reference_forward(params, obs):
    x = obs[0, :EMBEDDING_SIZE].astype(jnp.float32)                # self_obs = obs[0][:27]
    h = x @ params["w1"] + params["b1"]
    h = jnp.where(h >= 0.0, h, LEAKY_SLOPE * h)
    return h @ params["w2"] + params["b2"]


# ----------------------------------- main ------------------------------------
if __name__ == "__main__":
    key = jax.random.PRNGKey(0)
    k_params, k_obs = jax.random.split(key)

    params = init_params(k_params)
    obs = make_obs(k_obs)

    packed_params = pack_params(params)
    obs_padded = pad_obs(obs)

    probs = jax.block_until_ready(sampler_fcn_simple_forward(packed_params, obs_padded))
    ref = reference_forward(params, obs)

    assert probs.shape == (NUM_OUTPUTS,)
    assert bool(jnp.all(jnp.isfinite(probs)))
    assert bool(jnp.allclose(probs, ref, rtol=1e-5, atol=1e-5)), (probs, ref)
    print("KERNEL_OK")
</pallas_src>

<mosaic_0001>
module attributes {stable_mosaic.version = 11 : i64} {
  func.func @fused_mlp_kernel(%arg0: memref<1x128xf32, #tpu.memory_space<vmem>>, %arg1: memref<256x128xf32, #tpu.memory_space<vmem>>, %arg2: memref<1x128xf32, #tpu.memory_space<vmem>>) attributes {dimension_semantics = [], scalar_prefetch = 0 : i64, scratch_operands = 0 : i64, tpu.core_type = #tpu.core_type<tc>} {
    %c0 = arith.constant 0 : index
    %c0_0 = arith.constant 0 : index
    %0 = vector.load %arg0[%c0, %c0_0] : memref<1x128xf32, #tpu.memory_space<vmem>>, vector<1x128xf32>
    %c0_1 = arith.constant 0 : index
    %c0_2 = arith.constant 0 : index
    %1 = vector.load %arg1[%c0_1, %c0_2] : memref<256x128xf32, #tpu.memory_space<vmem>>, vector<128x128xf32>
    %c128 = arith.constant 128 : index
    %c0_3 = arith.constant 0 : index
    %2 = vector.load %arg1[%c128, %c0_3] : memref<256x128xf32, #tpu.memory_space<vmem>>, vector<128x128xf32>
    %cst = arith.constant dense<0.000000e+00> : vector<1x128xf32>
    %3 = tpu.matmul %0, %1, %cst {dimension_numbers = #tpu.dot_dimension_numbers<[1], [0], [0], [1], [0, 0, 1, 1], [], []>} : vector<1x128xf32>, vector<128x128xf32>, vector<1x128xf32> -> vector<1x128xf32>
    %cst_4 = arith.constant 0.000000e+00 : f32
    %4 = vector.broadcast %cst_4 : f32 to vector<1x128xf32>
    %5 = arith.cmpf oge, %3, %4 : vector<1x128xf32>
    %cst_5 = arith.constant 0.00999999977 : f32
    %6 = vector.broadcast %cst_5 : f32 to vector<1x128xf32>
    %7 = arith.mulf %6, %3 : vector<1x128xf32>
    %8 = arith.select %5, %3, %7 : vector<1x128xi1>, vector<1x128xf32>
    %cst_6 = arith.constant dense<0.000000e+00> : vector<1x128xf32>
    %9 = tpu.matmul %8, %2, %cst_6 {dimension_numbers = #tpu.dot_dimension_numbers<[1], [0], [0], [1], [0, 0, 1, 1], [], []>} : vector<1x128xf32>, vector<128x128xf32>, vector<1x128xf32> -> vector<1x128xf32>
    %c0_7 = arith.constant 0 : index
    %c0_8 = arith.constant 0 : index
    %10 = vector.load %arg2[%c0_7, %c0_8] : memref<1x128xf32, #tpu.memory_space<vmem>>, vector<1x128xf32>
    tpu.vector_store %arg2[%c0_7, %c0_8], %9 {strides = array<i32>} : memref<1x128xf32, #tpu.memory_space<vmem>>, vector<1x128xf32>,
    return
  }
}

</mosaic_0001>

<bundles_post_ra>
// kernel: sampler_fcn_simple_forward.1
= control target key start
LH: loop header
LB: loop body
LE: loop exit
PB: predicated region body
PF: predicated region fallthrough
CT: control target
= control target key end

     0   :  { %7 = vsyncpa [#allocation3], 0  ;;  %s389_s9 = smov [#allocation2]   ;;  %s444_s0 = inlined_call_operand.vmem [shape: f32[1,128], index: 0, kind: input, shape index: {}]   ;;  %s445_s1 = inlined_call_operand.hbm [shape: f32[256,128], index: 1, kind: input, shape index: {}]   ;;  %s446_s2 = inlined_call_operand.vmem [shape: f32[1,128], index: 2, kind: output, shape index: {}]  }
   0x1   :  { %s15_s10 = sshll.u32 %s389_s9, 4  ;;  %s365_s13 = scalar_lea.hbm %s445_s1, 4096  ;;  %s16_s10 = int_to_ptr.vmem [resolvable:$true] %s15_s10 }
   0x2   :  { %p366_p0 = scmp.ne.s32.totalorder %s445_s1, %s365_s13  ;;  %p369_p1 = scmp.lt.u32.totalorder %s365_s13, %s445_s1 }
   0x4   :  { %p371_p2 = pnand %p369_p1, %p366_p0 }
   0x6   :  { %374 = shalt.err (!%p371_p2)
}
   0x7   :  { %s375_s18 = scalar_lea.vmem %s16_s10, 4096  ;;  %p380_p4 = scmp.lt.s32.totalorder %s16_s10, %s16_s10 }
   0x8   :  { %p376_p3 = scmp.ne.s32.totalorder %s16_s10, %s375_s18  ;;  %p381_p5 = scmp.lt.s32.totalorder %s375_s18, %s375_s18 }
   0xa   :  { %p382_p6 = por %p381_p5, %p380_p4 }
   0xc   :  { %p383_p7 = pnand %p382_p6, %p376_p3 }
   0xe   :  { %386 = shalt.err (!%p383_p7)
}
   0xf   :  { %s390_s19 = smov 128   ;;  %s391_s20 = smov 8  }
  0x10   :  { %21 = dma.hbm_to_vmem [thread:$0]  %s445_s1, 4096, %s16_s10, [#allocation3], %s390_s19, %s390_s19, %s391_s20  }
  0x11   :  { %387 = dma.done.wait [#allocation3], 4096  }
  0x12   :  { %388 = vsyncadd [#allocation3], 4294963200  ;;  %v392_v0 = vmov 0.0|0.0   ;;  %vm393_vm0 = vmmov 0   ;;  %v394_v1 = vmov 0.0   ;;  %v26_v2 = vld [vmem:[#allocation2] sm:$0xff] }
  0x13   :  { %311 = vmatprep.subr.bf16.mxu0 %v392_v0  ;;  %273 = vmatprep.mubr.msk.f32.mxu0 %vm393_vm0, %v394_v1  ;;  %v27_v3 = vld [vmem:[#allocation2 + $0x8] sm:$0xff]  ;;  %v28_v4 = vld [vmem:[#allocation2 + $0x10] sm:$0xff]  ;;  %v29_v6 = vld [vmem:[#allocation2 + $0x18] sm:$0xff] }
  0x14   :  { %335 = vmatprep.subr.bf16.mxu1 %v392_v0  ;;  %308 = vmatprep.mubr.msk.f32.mxu1 %vm393_vm0, %v394_v1  ;;  %v312_v5 = vpack.c.bf16 %v27_v3, %v26_v2  ;;  %v315_v7 = vpack.c.bf16 %v29_v6, %v28_v4  ;;  %v30_v8 = vld [vmem:[#allocation2 + $0x20] sm:$0xff]  ;;  %v31_v9 = vld [vmem:[#allocation2 + $0x28] sm:$0xff]  ;;  %v44_v12 = vld [vmem:[#allocation2 + $0x90] sm:$0xff] }
  0x15   :  { %v42_v10 = vld [vmem:[#allocation2 + $0x80] sm:$0xff]  ;;  %v43_v11 = vld [vmem:[#allocation2 + $0x88] sm:$0xff]  ;;  %v45_v13 = vld [vmem:[#allocation2 + $0x98] sm:$0xff]  ;;  %v318_v14 = vpack.c.bf16 %v31_v9, %v30_v8 }
  0x16   :  { %313 = vmatpush3.bf16.msra.mxu0 %v312_v5  ;;  %v336_v15 = vpack.c.bf16 %v43_v11, %v42_v10  ;;  %v32_v16 = vld [vmem:[#allocation2 + $0x30] sm:$0xff]  ;;  %v33_v17 = vld [vmem:[#allocation2 + $0x38] sm:$0xff]  ;;  %v339_v18 = vpack.c.bf16 %v45_v13, %v44_v12  ;;  %v46_v19 = vld [vmem:[#allocation2 + $0xa0] sm:$0xff] }
  0x17   :  { %314 = vmatprep.subr.bf16.mxu0 %v392_v0  ;;  %v47_v20 = vld [vmem:[#allocation2 + $0xa8] sm:$0xff]  ;;  %v321_v21 = vpack.c.bf16 %v33_v17, %v32_v16  ;;  %v34_v22 = vld [vmem:[#allocation2 + $0x40] sm:$0xff]  ;;  %v48_v25 = vld [vmem:[#allocation2 + $0xb0] sm:$0xff] }
  0x18   :  { %337 = vmatpush3.bf16.msra.mxu1 %v336_v15  ;;  %v35_v23 = vld [vmem:[#allocation2 + $0x48] sm:$0xff]  ;;  %v342_v24 = vpack.c.bf16 %v47_v20, %v46_v19  ;;  %v49_v26 = vld [vmem:[#allocation2 + $0xb8] sm:$0xff]  ;;  %v36_v28 = vld [vmem:[#allocation2 + $0x50] sm:$0xff] }
  0x19   :  { %338 = vmatprep.subr.bf16.mxu1 %v392_v0  ;;  %v324_v27 = vpack.c.bf16 %v35_v23, %v34_v22  ;;  %v37_v29 = vld [vmem:[#allocation2 + $0x58] sm:$0xff]  ;;  %v345_v30 = vpack.c.bf16 %v49_v26, %v48_v25  ;;  %v50_v31 = vld [vmem:[#allocation2 + $0xc0] sm:$0xff]  ;;  %v51_v32 = vld [vmem:[#allocation2 + $0xc8] sm:$0xff] }
  0x1a   :  { %316 = vmatpush3.bf16.msra.mxu0 %v315_v7  ;;  %v327_v33 = vpack.c.bf16 %v37_v29, %v36_v28  ;;  %v38_v34 = vld [vmem:[#allocation2 + $0x60] sm:$0xff]  ;;  %v39_v35 = vld [vmem:[#allocation2 + $0x68] sm:$0xff]  ;;  %v348_v36 = vpack.c.bf16 %v51_v32, %v50_v31  ;;  %v52_v37 = vld [vmem:[#allocation2 + $0xd0] sm:$0xff] }
  0x1b   :  { %317 = vmatprep.subr.bf16.mxu0 %v392_v0  ;;  %v53_v38 = vld [vmem:[#allocation2 + $0xd8] sm:$0xff]  ;;  %v330_v39 = vpack.c.bf16 %v39_v35, %v38_v34  ;;  %v40_v40 = vld [vmem:[#allocation2 + $0x70] sm:$0xff]  ;;  %v54_v43 = vld [vmem:[#allocation2 + $0xe0] sm:$0xff] }
  0x1c   :  { %340 = vmatpush3.bf16.msra.mxu1 %v339_v18  ;;  %v41_v41 = vld [vmem:[#allocation2 + $0x78] sm:$0xff]  ;;  %v351_v42 = vpack.c.bf16 %v53_v38, %v52_v37  ;;  %v55_v44 = vld [vmem:[#allocation2 + $0xe8] sm:$0xff]  ;;  %v25_v47 = vld [vmem:[%s444_s0] sm:$0x1] }
  0x1d   :  { %341 = vmatprep.subr.bf16.mxu1 %v392_v0  ;;  %v333_v45 = vpack.c.bf16 %v41_v41, %v40_v40  ;;  %v354_v46 = vpack.c.bf16 %v55_v44, %v54_v43  ;;  %v56_v48 = vld [vmem:[#allocation2 + $0xf0] sm:$0xff]  ;;  %v57_v49 = vld [vmem:[#allocation2 + $0xf8] sm:$0xff] }
  0x1e   :  { %319 = vmatpush3.bf16.msra.mxu0 %v318_v14  ;;  %v357_v50 = vpack.c.bf16 %v57_v49, %v56_v48 }
  0x1f   :  { %320 = vmatprep.subr.bf16.mxu0 %v392_v0 }
  0x20   :  { %343 = vmatpush3.bf16.msra.mxu1 %v342_v24 }
  0x21   :  { %344 = vmatprep.subr.bf16.mxu1 %v392_v0 }
  0x22   :  { %322 = vmatpush3.bf16.msra.mxu0 %v321_v21 }
  0x23   :  { %323 = vmatprep.subr.bf16.mxu0 %v392_v0 }
  0x24   :  { %346 = vmatpush3.bf16.msra.mxu1 %v345_v30 }
  0x25   :  { %347 = vmatprep.subr.bf16.mxu1 %v392_v0 }
  0x26   :  { %325 = vmatpush3.bf16.msra.mxu0 %v324_v27 }
  0x27   :  { %326 = vmatprep.subr.bf16.mxu0 %v392_v0 }
  0x28   :  { %349 = vmatpush3.bf16.msra.mxu1 %v348_v36 }
  0x29   :  { %350 = vmatprep.subr.bf16.mxu1 %v392_v0 }
  0x2a   :  { %328 = vmatpush3.bf16.msra.mxu0 %v327_v33 }
  0x2b   :  { %329 = vmatprep.subr.bf16.mxu0 %v392_v0 }
  0x2c   :  { %352 = vmatpush3.bf16.msra.mxu1 %v351_v42 }
  0x2d   :  { %353 = vmatprep.subr.bf16.mxu1 %v392_v0 }
  0x2e   :  { %331 = vmatpush3.bf16.msra.mxu0 %v330_v39 }
  0x2f   :  { %332 = vmatprep.subr.bf16.mxu0 %v392_v0 }
  0x30   :  { %355 = vmatpush3.bf16.msra.mxu1 %v354_v46 }
  0x31   :  { %356 = vmatprep.subr.bf16.mxu1 %v392_v0 }
  0x32   :  { %334 = vmatpush3.bf16.msra.mxu0 %v333_v45 }
  0x34   :  { %358 = vmatpush3.bf16.msra.mxu1 %v357_v50 }
  0x35   :  { %274 = vmatmul.mubr.f32.vlgmr.msra.gmra.mrb[0].mxu0 %v25_v47 }
 0x108   :  { %v124_v51 = vpop.f32.mrb[0].mxu0 }
 0x109   :  { %vm128_vm1 = vcmp.ge.f32.partialorder %v124_v51, 0.0  ;;  %v129_v52 = vmul.f32 0.01, %v124_v51  ;;  %v275_v53 = vpop.f32.mrb[1].mxu0 }
 0x10b   :  { %v130_v54 = vsel %vm128_vm1, %v124_v51, %v129_v52 }
 0x10c   :  { %309 = vmatmul.mubr.f32.vlgmr.msra.gmra.mrb[0].mxu1 %v130_v54 }
 0x1df   :  { %v197_v55 = vpop.f32.mrb[0].mxu1 }
 0x1e0   :  { %201 = vst [vmem:[%s446_s2] sm:$0x1] %v197_v55  ;;  %v310_v56 = vpop.f32.mrb[1].mxu1 }
 0x1e1   :  { %206 = vsyncpa [#allocation3], 1 }

</bundles_post_ra>
